<compile_context>
chip_gen: v7x
topology: tpu7x:2x2x1
jax: 0.10.0
libtpu: 0.0.40
codegen_flags: <defaults>
</compile_context>

<pallas_src>
import jax
import jax.numpy as jnp
from jax import lax
from jax.experimental import pallas as pl
from jax.experimental.pallas import tpu as pltpu

MOMENTUM = 0.9
EPS = 1e-5


# ----------------------------------------------------------------------------- kernels


def _bn_fused_kernel(x_ref, params_ref, y_ref, rows_ref):
    """Single-pass kernel: full batch column-slab (B, td) resident in VMEM."""
    # Cast to f32 inside the kernel (VPU work hidden under the DMA).
    x = x_ref[...].astype(jnp.float32)                     # (B, td)
    b = x.shape[0]

    params = params_ref[...]                               # (4, td) f32
    lg = params[0:1, :]
    beta = params[1:2, :]
    rm = params[2:3, :]
    rv = params[3:4, :]

    # Per-feature batch statistics (reduction over the batch/sublane axis).
    mean = jnp.mean(x, axis=0, keepdims=True)              # (1, td)
    diff = x - mean                                        # (B, td)
    # torch.var default is unbiased -> divide by (B - 1); B >= 2 is enforced by
    # the wrapper.  (Intentionally not nn.BatchNorm1d's biased variance.)
    var = jnp.sum(diff * diff, axis=0, keepdims=True) * (1.0 / (b - 1))

    # EUP rsqrt; switch to 1.0 / jnp.sqrt(...) if bit-tighter torch parity is needed.
    inv_std = lax.rsqrt(var + EPS)
    scale = jnp.exp(lg) * inv_std                          # fold affine into one row
    y_ref[...] = (diff * scale + beta).astype(y_ref.dtype)

    # Row outputs: log|det J| (one row; expand_as happens in the wrapper) and
    # the functional running-stat updates.
    rows_ref[0:1, :] = lg - 0.5 * jnp.log(var + EPS)
    rows_ref[1:2, :] = rm * MOMENTUM + mean * (1.0 - MOMENTUM)
    rows_ref[2:3, :] = rv * MOMENTUM + var * (1.0 - MOMENTUM)


def _bn_stats_kernel(x_ref, stats_ref):
    """Two-pass path, pass 1: accumulate per-feature sum / sum-of-squares."""
    @pl.when(pl.program_id(1) == 0)
    def _():
        stats_ref[...] = jnp.zeros_like(stats_ref)

    x = x_ref[...].astype(jnp.float32)                     # (tb, td)
    stats_ref[0:1, :] += jnp.sum(x, axis=0, keepdims=True)
    stats_ref[1:2, :] += jnp.sum(x * x, axis=0, keepdims=True)


def _bn_apply_kernel(x_ref, row_ref, y_ref):
    """Two-pass path, pass 2: y = x * scale + shift (one FMA per element)."""
    x = x_ref[...].astype(jnp.float32)
    y_ref[...] = (x * row_ref[0:1, :] + row_ref[1:2, :]).astype(y_ref.dtype)


# ----------------------------------------------------------------------------- tiling


def _vmem_budget_and_limit():
    """Generation-aware VMEM sizing (v5e/v6e: 128 MiB, v7x: 64 MiB)."""
    try:
        cap = int(pltpu.get_tpu_info().vmem_capacity_bytes)
    except Exception:
        cap = 64 << 20            # conservative fallback is safe on every generation
    budget = int(cap * 0.70)      # target for the (double-buffered) tile footprint
    limit = int(cap * 0.90)       # scoped-VMEM limit handed to Mosaic
    return budget, limit


def _largest_tile(n, unit, cap):
    """Largest divisor of `n` that is a multiple of `unit` and <= cap (None if none)."""
    cap = min(n, cap)
    best = None
    k = unit
    while k <= cap:
        if n % k == 0:
            best = k
        k += unit
    return best


def _pick_fused_tile_d(B, D, x_itemsize, vmem_budget_bytes):
    """Feature-tile width for the single-pass kernel, or None if it can't fit."""
    # Per feature column: double-buffered x-in + y-out tiles (input dtype) plus
    # ~3 f32 (B, td) intermediates (x_f32, diff, y_f32); the 7 f32 param / row
    # buffers are negligible (+64 slack).
    per_col = B * (2 * x_itemsize + 2 * x_itemsize + 3 * 4) + 64
    max_td = vmem_budget_bytes // per_col
    if D % 128 != 0:
        # Irregular feature dim: single full-width block (block == array dims
        # satisfies the (8,128) rule) if it fits, else fall back to two-pass.
        return D if D <= max_td else None
    td = _largest_tile(D, 128, min(max_td, D))
    if td is None:
        return None
    if td == D and D >= 256:
        # Keep >= 2 grid steps so the "parallel" axis can shard across the two
        # TensorCores on v7x (cost is negligible on single-TC v5e/v6e).
        half = _largest_tile(D, 128, D // 2)
        if half is not None:
            td = half
    return td


# ----------------------------------------------------------------------------- drivers


def _fused_forward(x, params, td, vmem_limit_bytes):
    B, D = x.shape
    y, rows = pl.pallas_call(
        _bn_fused_kernel,
        out_shape=(
            jax.ShapeDtypeStruct((B, D), x.dtype),
            jax.ShapeDtypeStruct((3, D), jnp.float32),
        ),
        grid=(D // td,),
        in_specs=[
            pl.BlockSpec((B, td), lambda j: (0, j)),
            pl.BlockSpec((4, td), lambda j: (0, j)),
        ],
        out_specs=(
            pl.BlockSpec((B, td), lambda j: (0, j)),
            pl.BlockSpec((3, td), lambda j: (0, j)),
        ),
        compiler_params=pltpu.CompilerParams(
            dimension_semantics=("parallel",),
            vmem_limit_bytes=vmem_limit_bytes),
    )(x, params)
    return y, rows[0], rows[1], rows[2]


def _two_pass_forward(x, params, vmem_budget_bytes, vmem_limit_bytes):
    """Large-B fallback: batch-tiled stats accumulation, then a fused apply pass."""
    B, D = x.shape
    x_item = jnp.dtype(x.dtype).itemsize

    if D % 128 == 0:
        td = _largest_tile(D, 128, min(D, 4096))
        if td == D and D >= 256:
            half = _largest_tile(D, 128, D // 2)
            if half is not None:
                td = half
    else:
        td = D

    if B % 8 == 0:
        per_row = td * (2 * x_item + 2 * x_item + 2 * 4) + 64
        tb = _largest_tile(B, 8, max(8, vmem_budget_bytes // per_row))
    else:
        # TODO(synk): huge batches not divisible by 8 fall back to one full-height
        # block (may exceed VMEM); pad the batch upstream if this is ever hit.
        tb = B

    # Pass 1: per-feature sum / sum-of-squares, batch reduction as the trailing
    # "arbitrary" axis accumulating into a resident (2, td) output block.
    stats = pl.pallas_call(
        _bn_stats_kernel,
        out_shape=jax.ShapeDtypeStruct((2, D), jnp.float32),
        grid=(D // td, B // tb),
        in_specs=[pl.BlockSpec((tb, td), lambda j, i: (i, j))],
        out_specs=pl.BlockSpec((2, td), lambda j, i: (0, j)),
        compiler_params=pltpu.CompilerParams(
            dimension_semantics=("parallel", "arbitrary"),
            vmem_limit_bytes=vmem_limit_bytes),
    )(x)

    mean = stats[0] / B
    var = (stats[1] - B * mean * mean) / (B - 1)           # unbiased (torch.var default)

    lg, beta, rm, rv = params[0], params[1], params[2], params[3]
    inv_std = lax.rsqrt(var + EPS)
    scale = jnp.exp(lg) * inv_std
    shift = beta - mean * scale
    ld_row = lg - 0.5 * jnp.log(var + EPS)
    new_rm = rm * MOMENTUM + (1.0 - MOMENTUM) * mean
    new_rv = rv * MOMENTUM + (1.0 - MOMENTUM) * var

    scale_shift = jnp.stack([scale, shift], axis=0)        # (2, D) f32

    # Pass 2: y = x * scale + shift, fully parallel over both tile axes.
    y = pl.pallas_call(
        _bn_apply_kernel,
        out_shape=jax.ShapeDtypeStruct((B, D), x.dtype),
        grid=(D // td, B // tb),
        in_specs=[
            pl.BlockSpec((tb, td), lambda j, i: (i, j)),
            pl.BlockSpec((2, td), lambda j, i: (0, j)),
        ],
        out_specs=pl.BlockSpec((tb, td), lambda j, i: (i, j)),
        compiler_params=pltpu.CompilerParams(
            dimension_semantics=("parallel", "parallel"),
            vmem_limit_bytes=vmem_limit_bytes),
    )(x, scale_shift)
    return y, ld_row, new_rm, new_rv


def batchnorm_forward(x, log_gamma, beta, running_mean, running_var, *,
                      force_two_pass=False, vmem_budget_bytes=None):
    """Training-mode forward pass of the RealNVP BatchNorm layer.

    Args:
      x:            (B, D) float32 / bfloat16
      log_gamma, beta, running_mean, running_var: (D,) float32

    Returns:
      y (B, D) in x's dtype, log_abs_det_jacobian (B, D) f32,
      new_running_mean (D,) f32, new_running_var (D,) f32.
    """
    B, D = x.shape
    if B < 2:
        raise ValueError("RealNVP BatchNorm (training) needs B >= 2: torch.var(0) "
                         "is unbiased and divides by B - 1.")

    default_budget, vmem_limit = _vmem_budget_and_limit()
    budget = default_budget if vmem_budget_bytes is None else int(vmem_budget_bytes)

    params = jnp.stack([
        log_gamma.astype(jnp.float32),
        beta.astype(jnp.float32),
        running_mean.astype(jnp.float32),
        running_var.astype(jnp.float32),
    ], axis=0)                                             # (4, D)

    td = None if force_two_pass else _pick_fused_tile_d(
        B, D, jnp.dtype(x.dtype).itemsize, budget)
    if td is not None:
        y, ld_row, new_rm, new_rv = _fused_forward(x, params, td, vmem_limit)
    else:
        y, ld_row, new_rm, new_rv = _two_pass_forward(x, params, budget, vmem_limit)

    # expand_as(x): pure broadcast of the per-feature row, done outside the kernel.
    log_abs_det_jacobian = jnp.broadcast_to(
        ld_row.reshape(1, D).astype(jnp.float32), (B, D))
    return y, log_abs_det_jacobian, new_rm.reshape(D), new_rv.reshape(D)


# ----------------------------------------------------------------------------- test


def _reference(x, log_gamma, beta, running_mean, running_var, eps=EPS):
    """Pure-JAX reference mirroring the PyTorch forward (training mode)."""
    xf = x.astype(jnp.float32)
    mean = jnp.mean(xf, axis=0)
    var = jnp.var(xf, axis=0, ddof=1)
    x_hat = (xf - mean) / jnp.sqrt(var + eps)
    y = jnp.exp(log_gamma) * x_hat + beta
    ld = log_gamma - 0.5 * jnp.log(var + eps)
    new_rm = MOMENTUM * running_mean + (1 - MOMENTUM) * mean
    new_rv = MOMENTUM * running_var + (1 - MOMENTUM) * var
    return y, jnp.broadcast_to(ld, x.shape), new_rm, new_rv


def _run_case(key, B, D, **kwargs):
    kx, kg, kb = jax.random.split(key, 3)
    x = jax.random.normal(kx, (B, D), dtype=jnp.float32)
    log_gamma = 0.1 * jax.random.normal(kg, (D,), dtype=jnp.float32)
    beta = 0.1 * jax.random.normal(kb, (D,), dtype=jnp.float32)
    running_mean = jnp.zeros((D,), dtype=jnp.float32)
    running_var = jnp.ones((D,), dtype=jnp.float32)

    out = batchnorm_forward(x, log_gamma, beta, running_mean, running_var, **kwargs)
    out = jax.block_until_ready(out)
    y, ld, new_rm, new_rv = out

    y_ref, ld_ref, rm_ref, rv_ref = _reference(
        x, log_gamma, beta, running_mean, running_var)
    # atol loose enough to tolerate the EUP rsqrt/exp/log paths inside the kernel.
    assert jnp.allclose(y, y_ref, atol=1e-4, rtol=1e-5), "y mismatch"
    assert jnp.allclose(ld, ld_ref, atol=1e-4, rtol=1e-5), "log-det mismatch"
    assert jnp.allclose(new_rm, rm_ref, atol=1e-4, rtol=1e-5), "running_mean mismatch"
    assert jnp.allclose(new_rv, rv_ref, atol=1e-4, rtol=1e-5), "running_var mismatch"


if __name__ == "__main__":
    key = jax.random.PRNGKey(0)
    k0, k1, k2 = jax.random.split(key, 3)

    # Module-sized shape (input_size=32): one full-width block, fused path.
    _run_case(k0, B=8, D=32)
    # Lane-dense feature axis (D = 3 * 128): tiled fused path, grid length 3.
    _run_case(k1, B=16, D=384)
    # Exercise the large-B two-pass path (forced, tiny budget so the batch axis
    # actually splits into several accumulation steps).
    _run_case(k2, B=64, D=256, force_two_pass=True, vmem_budget_bytes=1 << 16)

    print("KERNEL_OK")
</pallas_src>

<mosaic_0001>
module attributes {stable_mosaic.version = 11 : i64} {
  func.func @_bn_fused_kernel(%arg0: i32, %arg1: memref<8x32xf32, #tpu.memory_space<vmem>>, %arg2: memref<4x32xf32, #tpu.memory_space<vmem>>, %arg3: memref<8x32xf32, #tpu.memory_space<vmem>>, %arg4: memref<3x32xf32, #tpu.memory_space<vmem>>) attributes {dimension_semantics = [#tpu.dimension_semantics<parallel>], iteration_bounds = array<i64: 1>, scalar_prefetch = 0 : i64, scratch_operands = 0 : i64, tpu.core_type = #tpu.core_type<tc>, window_params = [{transform_indices = @transform_0, window_bounds = array<i64: 8, 32>}, {transform_indices = @transform_1, window_bounds = array<i64: 4, 32>}, {transform_indices = @transform_2, window_bounds = array<i64: 8, 32>}, {transform_indices = @transform_3, window_bounds = array<i64: 3, 32>}]} {
    %c0 = arith.constant 0 : index
    %c0_0 = arith.constant 0 : index
    %0 = vector.load %arg1[%c0, %c0_0] : memref<8x32xf32, #tpu.memory_space<vmem>>, vector<8x32xf32>
    %c0_1 = arith.constant 0 : index
    %c0_2 = arith.constant 0 : index
    %1 = vector.load %arg2[%c0_1, %c0_2] : memref<4x32xf32, #tpu.memory_space<vmem>>, vector<4x32xf32>
    %2 = vector.extract_strided_slice %1 {offsets = [0, 0], sizes = [1, 32], strides = [1, 1]} : vector<4x32xf32> to vector<1x32xf32>
    %3 = vector.extract_strided_slice %1 {offsets = [1, 0], sizes = [1, 32], strides = [1, 1]} : vector<4x32xf32> to vector<1x32xf32>
    %4 = vector.extract_strided_slice %1 {offsets = [2, 0], sizes = [1, 32], strides = [1, 1]} : vector<4x32xf32> to vector<1x32xf32>
    %5 = vector.extract_strided_slice %1 {offsets = [3, 0], sizes = [1, 32], strides = [1, 1]} : vector<4x32xf32> to vector<1x32xf32>
    %cst = arith.constant dense<0.000000e+00> : vector<32xf32>
    %6 = vector.multi_reduction <add>, %0, %cst [0] : vector<8x32xf32> to vector<32xf32>
    %7 = vector.shape_cast %6 : vector<32xf32> to vector<1x32xf32>
    %cst_3 = arith.constant 8.000000e+00 : f32
    %8 = vector.broadcast %cst_3 : f32 to vector<1x32xf32>
    %9 = arith.divf %7, %8 : vector<1x32xf32>
    %10 = vector.broadcast %9 : vector<1x32xf32> to vector<8x32xf32>
    %11 = arith.subf %0, %10 : vector<8x32xf32>
    %12 = arith.mulf %11, %11 : vector<8x32xf32>
    %cst_4 = arith.constant dense<0.000000e+00> : vector<32xf32>
    %13 = vector.multi_reduction <add>, %12, %cst_4 [0] : vector<8x32xf32> to vector<32xf32>
    %14 = vector.shape_cast %13 : vector<32xf32> to vector<1x32xf32>
    %cst_5 = arith.constant 0.142857149 : f32
    %15 = vector.broadcast %cst_5 : f32 to vector<1x32xf32>
    %16 = arith.mulf %14, %15 : vector<1x32xf32>
    %cst_6 = arith.constant 9.99999974E-6 : f32
    %17 = vector.broadcast %cst_6 : f32 to vector<1x32xf32>
    %18 = arith.addf %16, %17 : vector<1x32xf32>
    %19 = math.rsqrt %18 : vector<1x32xf32>
    %20 = math.exp %2 : vector<1x32xf32>
    %21 = arith.mulf %20, %19 : vector<1x32xf32>
    %22 = vector.broadcast %21 : vector<1x32xf32> to vector<8x32xf32>
    %23 = arith.mulf %11, %22 : vector<8x32xf32>
    %24 = vector.broadcast %3 : vector<1x32xf32> to vector<8x32xf32>
    %25 = arith.addf %23, %24 : vector<8x32xf32>
    %c0_7 = arith.constant 0 : index
    %c0_8 = arith.constant 0 : index
    %26 = vector.load %arg3[%c0_7, %c0_8] : memref<8x32xf32, #tpu.memory_space<vmem>>, vector<8x32xf32>
    tpu.vector_store %arg3[%c0_7, %c0_8], %25 {strides = array<i32>} : memref<8x32xf32, #tpu.memory_space<vmem>>, vector<8x32xf32>,
    %cst_9 = arith.constant 9.99999974E-6 : f32
    %27 = vector.broadcast %cst_9 : f32 to vector<1x32xf32>
    %28 = arith.addf %16, %27 : vector<1x32xf32>
    %29 = math.log %28 : vector<1x32xf32>
    %cst_10 = arith.constant 5.000000e-01 : f32
    %30 = vector.broadcast %cst_10 : f32 to vector<1x32xf32>
    %31 = arith.mulf %30, %29 : vector<1x32xf32>
    %32 = arith.subf %2, %31 : vector<1x32xf32>
    %c0_11 = arith.constant 0 : index
    %c0_12 = arith.constant 0 : index
    %33 = vector.load %arg4[%c0_11, %c0_12] : memref<3x32xf32, #tpu.memory_space<vmem>>, vector<1x32xf32>
    tpu.vector_store %arg4[%c0_11, %c0_12], %32 {strides = array<i32>} : memref<3x32xf32, #tpu.memory_space<vmem>>, vector<1x32xf32>,
    %cst_13 = arith.constant 0.899999976 : f32
    %34 = vector.broadcast %cst_13 : f32 to vector<1x32xf32>
    %35 = arith.mulf %4, %34 : vector<1x32xf32>
    %cst_14 = arith.constant 1.000000e-01 : f32
    %36 = vector.broadcast %cst_14 : f32 to vector<1x32xf32>
    %37 = arith.mulf %9, %36 : vector<1x32xf32>
    %38 = arith.addf %35, %37 : vector<1x32xf32>
    %c1 = arith.constant 1 : index
    %c0_15 = arith.constant 0 : index
    %39 = vector.load %arg4[%c1, %c0_15] : memref<3x32xf32, #tpu.memory_space<vmem>>, vector<1x32xf32>
    tpu.vector_store %arg4[%c1, %c0_15], %38 {strides = array<i32>} : memref<3x32xf32, #tpu.memory_space<vmem>>, vector<1x32xf32>,
    %cst_16 = arith.constant 0.899999976 : f32
    %40 = vector.broadcast %cst_16 : f32 to vector<1x32xf32>
    %41 = arith.mulf %5, %40 : vector<1x32xf32>
    %cst_17 = arith.constant 1.000000e-01 : f32
    %42 = vector.broadcast %cst_17 : f32 to vector<1x32xf32>
    %43 = arith.mulf %16, %42 : vector<1x32xf32>
    %44 = arith.addf %41, %43 : vector<1x32xf32>
    %c2 = arith.constant 2 : index
    %c0_18 = arith.constant 0 : index
    %45 = vector.load %arg4[%c2, %c0_18] : memref<3x32xf32, #tpu.memory_space<vmem>>, vector<1x32xf32>
    tpu.vector_store %arg4[%c2, %c0_18], %44 {strides = array<i32>} : memref<3x32xf32, #tpu.memory_space<vmem>>, vector<1x32xf32>,
    return
  }
  func.func @transform_0(%arg0: i32) -> (i32, i32) {
    %c0_i32 = arith.constant 0 : i32
    %c0_i32_0 = arith.constant 0 : i32
    return %c0_i32, %arg0 : i32, i32
  }
  func.func @transform_1(%arg0: i32) -> (i32, i32) {
    %c0_i32 = arith.constant 0 : i32
    %c0_i32_0 = arith.constant 0 : i32
    return %c0_i32, %arg0 : i32, i32
  }
  func.func @transform_2(%arg0: i32) -> (i32, i32) {
    %c0_i32 = arith.constant 0 : i32
    %c0_i32_0 = arith.constant 0 : i32
    return %c0_i32, %arg0 : i32, i32
  }
  func.func @transform_3(%arg0: i32) -> (i32, i32) {
    %c0_i32 = arith.constant 0 : i32
    %c0_i32_0 = arith.constant 0 : i32
    return %c0_i32, %arg0 : i32, i32
  }
}

</mosaic_0001>

<bundles_post_ra>
// kernel: tpu_custom_call.1
= control target key start
LH: loop header
LB: loop body
LE: loop exit
PB: predicated region body
PF: predicated region fallthrough
CT: control target
= control target key end

     0   :  { %9 = vsyncpa [#allocation3], 0  ;;  %s303_s0 = inlined_call_operand.hbm [shape: f32[8,32], index: 0, kind: input, shape index: {}]   ;;  %s304_s1 = inlined_call_operand.hbm [shape: f32[4,32], index: 1, kind: input, shape index: {}]   ;;  %s305_s2 = inlined_call_operand.hbm [shape: f32[8,32], index: 2, kind: output, shape index: {0}]   ;;  %s306_s3 = inlined_call_operand.hbm [shape: f32[3,32], index: 3, kind: output, shape index: {1}]  }
   0x1   :  { %10 = vsyncpa [#allocation6], 0 }
   0x2   :  { %11 = vsyncpa [#allocation4], 0 }
   0x3   :  { %12 = vsyncpa [#allocation9], 0  ;;  %s228_s12 = smov [#allocation2]   ;;  %s229_s14 = smov [#allocation5]  }
   0x4   :  { %s19_s13 = sshll.u32 %s228_s12, 4  ;;  %s29_s15 = sshll.u32 %s229_s14, 4  ;;  %s20_s13 = int_to_ptr.vmem [resolvable:$true] %s19_s13  ;;  %s30_s15 = int_to_ptr.vmem [resolvable:$true] %s29_s15 }
   0x5   :  { %s132_s18 = scalar_lea.hbm %s303_s0, 128 }
   0x6   :  { %p133_p0 = scmp.ne.s32.totalorder %s303_s0, %s132_s18  ;;  %p136_p1 = scmp.lt.u32.totalorder %s132_s18, %s303_s0 }
   0x8   :  { %p138_p2 = pnand %p136_p1, %p133_p0 }
   0xa   :  { %141 = shalt.err (!%p138_p2)
}
   0xb   :  { %s142_s23 = scalar_lea.vmem %s20_s13, 128  ;;  %p147_p4 = scmp.lt.s32.totalorder %s20_s13, %s20_s13 }
   0xc   :  { %p143_p3 = scmp.ne.s32.totalorder %s20_s13, %s142_s23  ;;  %p148_p5 = scmp.lt.s32.totalorder %s142_s23, %s142_s23 }
   0xe   :  { %p149_p6 = por %p148_p5, %p147_p4 }
  0x10   :  { %p150_p7 = pnand %p149_p6, %p143_p3 }
  0x12   :  { %153 = shalt.err (!%p150_p7)
}
  0x13   :  { %22 = dma.hbm_to_vmem [thread:$0]  %s303_s0, 128, %s20_s13, [#allocation3]  }
  0x14   :  { %s154_s28 = scalar_lea.hbm %s304_s1, 64 }
  0x15   :  { %p155_p8 = scmp.ne.s32.totalorder %s304_s1, %s154_s28  ;;  %p158_p9 = scmp.lt.u32.totalorder %s154_s28, %s304_s1 }
  0x17   :  { %p160_p10 = pnand %p158_p9, %p155_p8 }
  0x19   :  { %163 = shalt.err (!%p160_p10)
}
  0x1a   :  { %s164_s6 = scalar_lea.vmem %s30_s15, 64  ;;  %p169_p12 = scmp.lt.s32.totalorder %s30_s15, %s30_s15 }
  0x1b   :  { %p165_p11 = scmp.ne.s32.totalorder %s30_s15, %s164_s6  ;;  %p170_p13 = scmp.lt.s32.totalorder %s164_s6, %s164_s6 }
  0x1d   :  { %p171_p0 = por %p170_p13, %p169_p12 }
  0x1f   :  { %p172_p1 = pnand %p171_p0, %p165_p11 }
  0x21   :  { %175 = shalt.err (!%p172_p1)
}
  0x22   :  { %32 = dma.hbm_to_vmem [thread:$0]  %s304_s1, 64, %s30_s15, [#allocation6]  }
  0x23   :  { %220 = dma.done.wait [#allocation3], 128  }
  0x24   :  { %221 = vsyncadd [#allocation3], 4294967168 }
  0x25   :  { %222 = dma.done.wait [#allocation6], 64  }
  0x26   :  { %223 = vsyncadd [#allocation6], 4294967232  ;;  %vm41_vm0 = vcmask 261120   ;;  %v39_v0 = vld [vmem:[#allocation2] sm:$0xff]  ;;  %v40_v8 = vld [vmem:[#allocation5] sm:$0xf]  ;;  %v66_v27 = vlaneseq }
  0x27   :  { %v42_v1 = vsel %vm41_vm0, %v39_v0, 0.0  ;;  %v83_v10 = vmul.f32 0.9, %v40_v8  ;;  %vm86_vm1 = vcmask 256002   ;;  %v63_v22 = vmul.f32 1.442695, %v40_v8 }
  0x28   :  { %v43_v2 = vrot.slane %v42_v1, 4  ;;  %vm90_vm2 = vcmask 257027   ;;  %v67_v28 = vshrl.u32 %v66_v27, 7  ;;  %s230_s1 = smov [#allocation8]   ;;  %s231_s9 = smov [#allocation7]   ;;  %vm81_vm3 = vcmask 253952  }
  0x29   :  { %126 = vpow2.f32 %v63_v22  ;;  %s108_s8 = sshll.u32 %s230_s1, 4  ;;  %s98_s10 = sshll.u32 %s231_s9, 4  ;;  %s109_s8 = int_to_ptr.vmem [resolvable:$true] %s108_s8  ;;  %s99_s10 = int_to_ptr.vmem [resolvable:$true] %s98_s10 }
  0x2a   :  { %v44_v3 = vadd.f32 %v43_v2, %v42_v1  ;;  %v68_v30 = vsub.s32 0, %v67_v28  ;;  %v73_v31 = vsub.s32 1, %v67_v28  ;;  %s176_s11 = scalar_lea.vmem %s109_s8, 64  ;;  %p181_p3 = scmp.lt.s32.totalorder %s109_s8, %s109_s8 }
  0x2b   :  { %p177_p2 = scmp.ne.s32.totalorder %s109_s8, %s176_s11  ;;  %p182_p4 = scmp.lt.s32.totalorder %s176_s11, %s176_s11 }
  0x2c   :  { %v45_v4 = vrot.slane %v44_v3, 2  ;;  %v74_v37 = vrot.slane %v40_v8, %v73_v31 }
  0x2d   :  { %p183_p5 = por %p182_p4, %p181_p3 }
  0x2e   :  { %v46_v5 = vadd.f32 %v45_v4, %v44_v3 }
  0x2f   :  { %p184_p6 = pnand %p183_p5, %p177_p2 }
  0x30   :  { %v47_v6 = vrot.slane %v46_v5, 1 }
  0x32   :  { %v48_v7 = vadd.f32 %v47_v6, %v46_v5 }
  0x33   :  { %v127_v29 = vpop.eup %126 }
  0x34   :  { %v50_v9 = vmul.f32 0.125, %v48_v7 }
  0x36   :  { %v51_v11 = vsub.f32 %v39_v0, %v50_v9  ;;  %v84_v12 = vmul.f32 0.1, %v50_v9 }
  0x38   :  { %v52_v13 = vmul.f32 %v51_v11, %v51_v11  ;;  %v85_v14 = vadd.f32 %v84_v12, %v83_v10 }
  0x3a   :  { %v53_v15 = vsel %vm41_vm0, %v52_v13, 0.0  ;;  %87 = vst.msk [vmem:[#allocation8 - $0x1] sm:$0x4] %vm86_vm1, %v85_v14 }
  0x3b   :  { %v54_v16 = vrot.slane %v53_v15, 4 }
  0x3d   :  { %v55_v17 = vadd.f32 %v54_v16, %v53_v15 }
  0x3f   :  { %v56_v18 = vrot.slane %v55_v17, 2 }
  0x41   :  { %v57_v19 = vadd.f32 %v56_v18, %v55_v17 }
  0x43   :  { %v58_v20 = vrot.slane %v57_v19, 1 }
  0x45   :  { %v59_v21 = vadd.f32 %v58_v20, %v57_v19 }
  0x47   :  { %v60_v23 = vmul.f32 0.14285715, %v59_v21 }
  0x49   :  { %v61_v24 = vadd.f32 1e-05, %v60_v23  ;;  %v88_v25 = vmul.f32 0.1, %v60_v23 }
  0x4b   :  { %128 = vrsqrt.f32 %v61_v24  ;;  %v89_v26 = vadd.f32 %v88_v25, %v83_v10 }
  0x4c   :  { %130 = vlog2.f32 %v61_v24 }
  0x4d   :  { %91 = vst.msk [vmem:[#allocation8 - $0x1] sm:$0x8] %vm90_vm2, %v89_v26 }
  0x55   :  { %v129_v32 = vpop.eup %128 }
  0x56   :  { %v131_v33 = vpop.eup %130  ;;  %v65_v34 = vmul.f32 %v129_v32, %v127_v29 }
  0x57   :  { %v78_v35 = vmul.f32 0.6931472, %v131_v33 }
  0x58   :  { %v69_v36 = vrot.slane %v65_v34, %v68_v30 }
  0x59   :  { %v79_v38 = vmul.f32 0.5, %v78_v35 }
  0x5a   :  { %v70_v39 = vmul.f32 %v69_v36, %v51_v11 }
  0x5b   :  { %v80_v40 = vsub.f32 %v40_v8, %v79_v38 }
  0x5c   :  { %v75_v41 = vadd.f32 %v74_v37, %v70_v39 }
  0x5d   :  { %82 = vst.msk [vmem:[#allocation8] sm:$0x1] %vm81_vm3, %v80_v40 }
  0x5e   :  { %76 = vst.msk [vmem:[#allocation7] sm:$0xff] %vm41_vm0, %v75_v41 }
  0x5f   :  { %187 = shalt.err (!%p184_p6)
}
  0x60   :  { %s188_s14 = scalar_lea.hbm %s306_s3, 64 }
  0x61   :  { %p189_p7 = scmp.ne.s32.totalorder %s306_s3, %s188_s14  ;;  %p192_p8 = scmp.lt.u32.totalorder %s188_s14, %s306_s3 }
  0x63   :  { %p194_p9 = pnand %p192_p8, %p189_p7 }
  0x65   :  { %197 = shalt.err (!%p194_p9)
}
  0x66   :  { %111 = dma.vmem_to_hbm [thread:$0]  %s109_s8, 64, %s306_s3, [#allocation9]  }
  0x67   :  { %s198_s21 = scalar_lea.vmem %s99_s10, 128  ;;  %p203_p11 = scmp.lt.s32.totalorder %s99_s10, %s99_s10 }
  0x68   :  { %p199_p10 = scmp.ne.s32.totalorder %s99_s10, %s198_s21  ;;  %p204_p12 = scmp.lt.s32.totalorder %s198_s21, %s198_s21 }
  0x6a   :  { %p205_p13 = por %p204_p12, %p203_p11 }
  0x6c   :  { %p206_p0 = pnand %p205_p13, %p199_p10 }
  0x6e   :  { %209 = shalt.err (!%p206_p0)
}
  0x6f   :  { %s210_s24 = scalar_lea.hbm %s305_s2, 128 }
  0x70   :  { %p211_p1 = scmp.ne.s32.totalorder %s305_s2, %s210_s24  ;;  %p214_p2 = scmp.lt.u32.totalorder %s210_s24, %s305_s2 }
  0x72   :  { %p216_p3 = pnand %p214_p2, %p211_p1 }
  0x74   :  { %219 = shalt.err (!%p216_p3)
}
  0x75   :  { %101 = dma.vmem_to_hbm [thread:$0]  %s99_s10, 128, %s305_s2, [#allocation4]  }
  0x76   :  { %224 = dma.done.wait [#allocation4], 128  }
  0x77   :  { %225 = vsyncadd [#allocation4], 4294967168 }
  0x78   :  { %226 = dma.done.wait [#allocation9], 64  }
  0x79   :  { %227 = vsyncadd [#allocation9], 4294967232 }
  0x7a   :  { %118 = vsyncpa [#allocation3], 1 }
  0x7b   :  { %119 = vsyncpa [#allocation6], 1 }
  0x7c   :  { %120 = vsyncpa [#allocation4], 1 }
  0x7d   :  { %121 = vsyncpa [#allocation9], 1 }

</bundles_post_ra>
